<compile_context>
chip_gen: v5e
topology: v5e:2x2
jax: 0.10.0
libtpu: 0.0.40
codegen_flags: <defaults>
</compile_context>

<pallas_src>
import functools

import jax
import jax.numpy as jnp
from jax.experimental import pallas as pl
from jax.experimental.pallas import tpu as pltpu


# Below this size, jnp.copy (fused/elided by XLA) beats a pallas_call launch.
_PALLAS_COPY_MIN_BYTES = 256 * 1024
# Above this size, split the copy into multiple concurrent DMAs.
_CHUNK_BYTES_THRESHOLD = 1 * 1024 * 1024


def _dma_copy_kernel(x_hbm, o_hbm, sems, *, num_chunks):
    """Pure HBM->HBM copy: `num_chunks` concurrent rectangular DMAs.

    x_hbm / o_hbm are (num_chunks, chunk_len) refs living in HBM
    (memory_space=pl.ANY).  No VMEM, no grid, no vector slots.
    """
    copies = []
    for i in range(num_chunks):  # static unroll; descriptors issued back-to-back
        cp = pltpu.make_async_copy(x_hbm.at[i], o_hbm.at[i], sems.at[i])
        cp.start()
        copies.append(cp)
    for cp in copies:  # wait only after ALL copies are in flight
        cp.wait()


def identity_copy(x):
    """Materialize a copy of `x` with pure HBM->HBM DMA(s) (no VMEM staging)."""
    n = int(x.size)
    if n == 0:
        return jnp.copy(x)
    nbytes = n * x.dtype.itemsize

    # Pick the number of concurrent DMAs: 1 for modest sizes, up to 8 for
    # large residuals (only if the flattened length splits evenly).
    num_chunks = 1
    if nbytes >= _CHUNK_BYTES_THRESHOLD:
        for cand in (8, 4, 2):
            if n % cand == 0:
                num_chunks = cand
                break

    flat = x.reshape(num_chunks, n // num_chunks)  # contiguous: metadata-only

    out = pl.pallas_call(
        functools.partial(_dma_copy_kernel, num_chunks=num_chunks),
        out_shape=jax.ShapeDtypeStruct((num_chunks, n // num_chunks), x.dtype),
        in_specs=[pl.BlockSpec(memory_space=pl.ANY)],
        out_specs=pl.BlockSpec(memory_space=pl.ANY),
        scratch_shapes=[pltpu.SemaphoreType.DMA((num_chunks,))],
        cost_estimate=pl.CostEstimate(
            flops=0, transcendentals=0, bytes_accessed=2 * nbytes
        ),
    )(flat)
    return out.reshape(x.shape)


def push_block(
    hidden_states,
    time_emb,
    text_emb,
    res_stack,
    *,
    materialize_copy=False,
    force_pallas_copy=False,
    **kwargs,
):
    """JAX/Pallas equivalent of PushBlock.forward.

    `res_stack` is a Python list used as a stack (mutated in place, exactly
    like the PyTorch module).  NOTE: it holds arrays/tracers, so push_block
    must be called inside the traced UNet body, not across a jit boundary.

    By default the same array object is appended -- identical semantics to the
    PyTorch module (reference push, no tensor compute).  With
    materialize_copy=True the pushed residual gets its own buffer: small
    tensors use jnp.copy (XLA handles it), large residuals use the pure-DMA
    Pallas kernel.  force_pallas_copy=True forces the Pallas kernel regardless
    of size (used for testing).
    """
    if materialize_copy:
        nbytes = hidden_states.size * hidden_states.dtype.itemsize
        if force_pallas_copy or nbytes >= _PALLAS_COPY_MIN_BYTES:
            pushed = identity_copy(hidden_states)
        else:
            pushed = jnp.copy(hidden_states)  # small: let XLA fuse/elide
    else:
        pushed = hidden_states
    res_stack.append(pushed)
    return (hidden_states, time_emb, text_emb, res_stack)


if __name__ == "__main__":
    key = jax.random.PRNGKey(0)
    k1, k2, k3, k4 = jax.random.split(key, 4)

    # Small shapes consistent with a UNet down-block push: NCHW activations.
    N, C, H, W = 2, 4, 16, 16
    hidden_states = jax.random.normal(k1, (N, C, H, W), dtype=jnp.float32)
    time_emb = jax.random.normal(k2, (N, 32), dtype=jnp.float32)
    text_emb = jax.random.normal(k3, (N, 8, 32), dtype=jnp.float32)

    # 1) Default path: exact PyTorch semantics (push the reference, no copy).
    res_stack = []
    out_hidden, out_time, out_text, out_stack = push_block(
        hidden_states, time_emb, text_emb, res_stack
    )
    assert out_hidden is hidden_states
    assert out_time is time_emb and out_text is text_emb
    assert out_stack is res_stack and len(res_stack) == 1
    assert res_stack[-1] is hidden_states

    # 2) Materialize path on a SMALL tensor: routed to jnp.copy (below the
    #    Pallas threshold), still an independent, equal buffer.
    out_hidden2, _, _, out_stack2 = push_block(
        hidden_states, time_emb, text_emb, res_stack, materialize_copy=True
    )
    small_pushed = out_stack2[-1]
    jax.block_until_ready(small_pushed)
    assert out_hidden2 is hidden_states
    assert len(res_stack) == 2
    assert small_pushed is not hidden_states
    assert small_pushed.shape == hidden_states.shape
    assert jnp.array_equal(small_pushed, hidden_states), "small copy mismatch"

    # 3) Pallas pure-DMA path forced on the small tensor (single DMA, K=1).
    _, _, _, out_stack3 = push_block(
        hidden_states, time_emb, text_emb, res_stack,
        materialize_copy=True, force_pallas_copy=True,
    )
    pallas_pushed = out_stack3[-1]
    jax.block_until_ready(pallas_pushed)
    assert len(res_stack) == 3
    assert pallas_pushed is not hidden_states
    assert pallas_pushed.shape == hidden_states.shape
    assert pallas_pushed.dtype == hidden_states.dtype
    assert jnp.array_equal(pallas_pushed, hidden_states), "DMA copy mismatch"

    # 4) Larger residual (2 MiB) exercises the chunked concurrent-DMA path.
    big = jax.random.normal(k4, (2, 64, 64, 64), dtype=jnp.float32)  # 2 MiB
    big_copy = identity_copy(big)
    jax.block_until_ready(big_copy)
    assert big_copy.shape == big.shape and big_copy.dtype == big.dtype
    assert jnp.array_equal(big_copy, big), "chunked DMA copy mismatch"

    print("KERNEL_OK")
</pallas_src>

<mosaic_0001>
module attributes {stable_mosaic.version = 11 : i64} {
  func.func @_dma_copy_kernel(%arg0: memref<1x2048xf32, #tpu.memory_space<any>>, %arg1: memref<1x2048xf32, #tpu.memory_space<any>>, %arg2: memref<1x!tpu.dma_semaphore, #tpu.memory_space<semaphore_mem>>) attributes {dimension_semantics = [], scalar_prefetch = 0 : i64, scratch_operands = 1 : i64, tpu.core_type = #tpu.core_type<tc>} {
    %c0_i32 = arith.constant 0 : i32
    %c0_i32_0 = arith.constant 0 : i32
    %c0_i32_1 = arith.constant 0 : i32
    %c0_i32_2 = arith.constant 0 : i32
    %0 = tpu.memref_slice %arg0[%c0_i32, %c0_i32_2] : memref<1x2048xf32, #tpu.memory_space<any>> -> memref<1x2048xf32, #tpu.memory_space<any>>
    %1 = tpu.memref_squeeze %0 : memref<1x2048xf32, #tpu.memory_space<any>> -> memref<2048xf32, #tpu.memory_space<any>>
    %c0_i32_3 = arith.constant 0 : i32
    %2 = tpu.memref_slice %arg1[%c0_i32_0, %c0_i32_3] : memref<1x2048xf32, #tpu.memory_space<any>> -> memref<1x2048xf32, #tpu.memory_space<any>>
    %3 = tpu.memref_squeeze %2 : memref<1x2048xf32, #tpu.memory_space<any>> -> memref<2048xf32, #tpu.memory_space<any>>
    %4 = tpu.memref_slice %arg2[%c0_i32_1] : memref<1x!tpu.dma_semaphore, #tpu.memory_space<semaphore_mem>> -> memref<1x!tpu.dma_semaphore, #tpu.memory_space<semaphore_mem>>
    %5 = tpu.memref_squeeze %4 : memref<1x!tpu.dma_semaphore, #tpu.memory_space<semaphore_mem>> -> memref<!tpu.dma_semaphore, #tpu.memory_space<semaphore_mem>>
    tpu.enqueue_dma source(%1 : memref<2048xf32, #tpu.memory_space<any>>) target(%3 : memref<2048xf32, #tpu.memory_space<any>>) target_semaphore(%5 : memref<!tpu.dma_semaphore, #tpu.memory_space<semaphore_mem>>)
    %c0_i32_4 = arith.constant 0 : i32
    %c0_i32_5 = arith.constant 0 : i32
    %c0_i32_6 = arith.constant 0 : i32
    %c0_i32_7 = arith.constant 0 : i32
    %6 = tpu.memref_slice %arg0[%c0_i32_4, %c0_i32_7] : memref<1x2048xf32, #tpu.memory_space<any>> -> memref<1x2048xf32, #tpu.memory_space<any>>
    %7 = tpu.memref_squeeze %6 : memref<1x2048xf32, #tpu.memory_space<any>> -> memref<2048xf32, #tpu.memory_space<any>>
    %c0_i32_8 = arith.constant 0 : i32
    %8 = tpu.memref_slice %arg1[%c0_i32_5, %c0_i32_8] : memref<1x2048xf32, #tpu.memory_space<any>> -> memref<1x2048xf32, #tpu.memory_space<any>>
    %9 = tpu.memref_squeeze %8 : memref<1x2048xf32, #tpu.memory_space<any>> -> memref<2048xf32, #tpu.memory_space<any>>
    %10 = tpu.memref_slice %arg2[%c0_i32_6] : memref<1x!tpu.dma_semaphore, #tpu.memory_space<semaphore_mem>> -> memref<1x!tpu.dma_semaphore, #tpu.memory_space<semaphore_mem>>
    %11 = tpu.memref_squeeze %10 : memref<1x!tpu.dma_semaphore, #tpu.memory_space<semaphore_mem>> -> memref<!tpu.dma_semaphore, #tpu.memory_space<semaphore_mem>>
    tpu.wait_dma2 semaphore(%11 : memref<!tpu.dma_semaphore, #tpu.memory_space<semaphore_mem>>) src(%7 : memref<2048xf32, #tpu.memory_space<any>>) dst(%9 : memref<2048xf32, #tpu.memory_space<any>>)
    return
  }
}

</mosaic_0001>

<bundles_post_ra>
// kernel: tpu_custom_call.1
= control target key start
LH: loop header
LB: loop body
LE: loop exit
PB: predicated region body
PF: predicated region fallthrough
CT: control target
= control target key end

     0   :  { %s31_s12 = smov [#allocation2]   ;;  %s32_s13 = smov [#allocation3]   ;;  %s50_s0 = inlined_call_operand.hbm [shape: f32[1,2048], index: 0, kind: input, shape index: {}]   ;;  %s51_s1 = inlined_call_operand.hbm [shape: f32[1,2048], index: 1, kind: output, shape index: {}]  }
   0x1   :  { %s10_s8 = sshll.u32 %s50_s0, 4  ;;  %s12_s11 = sshll.u32 %s51_s1, 4  ;;  %s11_s8 = int_to_ptr.hbm [resolvable:$true] %s10_s8  ;;  %s13_s11 = int_to_ptr.hbm [resolvable:$true] %s12_s11 }
   0x2   :  { %s33_s14 = smov 0  }
   0x3   :  { %16 = dma.general %s11_s8, 256, %s13_s11, %s31_s12, %s32_s13, [#allocation4], %s33_s14, 0  }
   0x4   :  { %29 = dma.done.wait [#allocation2], 256 }
   0x5   :  { %30 = vsyncadd [#allocation2], 4294967040 }
   0x6   :  { %19 = vsyncmov [#allocation2] }
   0x9   :  { %s20_s15 = vpop.sfrf %19 }
   0xa   :  { %p25_p0 = scmp.ne.s32.totalorder %s20_s15, 0 }
   0xc   :  { %24 = shalt.err (%p25_p0)  }

</bundles_post_ra>
